<compile_context>
chip_gen: v7x
topology: tpu7x:2x2x1
jax: 0.10.0
libtpu: 0.0.40
codegen_flags: <defaults>
</compile_context>

<pallas_src>
import jax
import jax.numpy as jnp
from jax.experimental import pallas as pl
from jax.experimental.pallas import tpu as pltpu


def _vmem_budgets():
    """(vmem_limit_bytes, per-output block budget bytes), generation-aware.

    Total resident VMEM ~= 2 outputs * 2 buffers * block + tiny state block,
    so the block budget is kept at <= ~1/4 of the requested limit.
    """
    # Conservative defaults, safe on v7x (64 MiB physical VMEM per TC).
    vmem_limit = 48 * 1024 * 1024
    block_budget = 10 * 1024 * 1024
    try:
        info = pltpu.get_tpu_info()
        phys = getattr(info, "vmem_capacity_bytes", 0)
        if phys and phys >= 128 * 1024 * 1024:  # v5e / v6e
            vmem_limit = 64 * 1024 * 1024
            block_budget = 14 * 1024 * 1024
    except Exception:
        pass
    return vmem_limit, block_budget


def _choose_batch_tile(batch: int, layers: int, embed: int, itemsize: int,
                       block_budget: int) -> int:
    """Largest legal batch tile fitting the per-output VMEM block budget.

    Legal means: tb is a multiple of the sublane packing for this dtype, OR
    tb == batch (full-extent blocks are always legal).  tb is NOT required to
    divide batch; the partial last tile is masked by Pallas.
    """
    align = max(8, 32 // itemsize)  # f32 -> 8, bf16 -> 16, int8/fp8 -> 32
    row_bytes = layers * embed * itemsize
    if batch * row_bytes <= block_budget or batch <= align:
        return batch  # full-extent block: fits budget or is tiny anyway
    tb = (block_budget // row_bytes) // align * align
    tb = max(align, tb)
    if tb >= batch:
        return batch
    return tb


def _repeat_kernel(state_ref, h_ref, c_ref):
    # state_ref: (2, layers, 1, embed)     -- resident across all batch tiles
    # h_ref/c_ref: (layers, TB, embed)     -- one batch tile of each output
    # Cast the tiny state first, then broadcast over the sublane (batch) axis;
    # the broadcast + store hides under the output write-back DMA.
    h_ref[...] = jnp.broadcast_to(state_ref[0].astype(h_ref.dtype), h_ref.shape)
    c_ref[...] = jnp.broadcast_to(state_ref[1].astype(c_ref.dtype), c_ref.shape)


def lstm_state_gen_unrepeated(state: jax.Array):
    """Non-materializing variant: returns the un-repeated (layers, 1, embed)
    halves for a downstream kernel that can broadcast over batch itself."""
    return ((state[0], state[1]),)


def lstm_state_gen_forward(state: jax.Array, batch: int, *,
                           out_dtype=None, allow_xla_fallback: bool = True):
    """state: (2, layers, 1, embed) -> ((h0, c0),), each (layers, batch, embed)."""
    two, layers, one, embed = state.shape
    assert two == 2 and one == 1

    out_dtype = state.dtype if out_dtype is None else jnp.dtype(out_dtype)
    itemsize = out_dtype.itemsize
    out_bytes = 2 * layers * batch * embed * itemsize

    # Tiny / lane-sparse shapes: XLA's native broadcast is already at roofline
    # and avoids custom-call launch overhead.
    if allow_xla_fallback and (embed < 128 or out_bytes < (1 << 20)):
        full = jnp.broadcast_to(state.astype(out_dtype),
                                (2, layers, batch, embed))
        return ((full[0], full[1]),)

    vmem_limit, block_budget = _vmem_budgets()
    tb = _choose_batch_tile(batch, layers, embed, itemsize, block_budget)
    num_batch_tiles = pl.cdiv(batch, tb)

    out_struct = jax.ShapeDtypeStruct((layers, batch, embed), out_dtype)

    h0, c0 = pl.pallas_call(
        _repeat_kernel,
        out_shape=(out_struct, out_struct),
        grid_spec=pltpu.PrefetchScalarGridSpec(
            num_scalar_prefetch=0,
            grid=(num_batch_tiles,),
            in_specs=[
                # Whole tiny state as one block; constant index_map -> stays
                # VMEM-resident across all batch tiles.
                pl.BlockSpec((2, layers, 1, embed), lambda b: (0, 0, 0, 0)),
            ],
            out_specs=[
                pl.BlockSpec((layers, tb, embed), lambda b: (0, b, 0)),
                pl.BlockSpec((layers, tb, embed), lambda b: (0, b, 0)),
            ],
        ),
        compiler_params=pltpu.CompilerParams(
            dimension_semantics=("parallel",),
            vmem_limit_bytes=vmem_limit,
        ),
        cost_estimate=pl.CostEstimate(
            flops=0,
            transcendentals=0,
            bytes_accessed=out_bytes + state.size * state.dtype.itemsize,
        ),
    )(state)

    # Match PyTorch: tuple(state.repeat(...)) splits along dim 0, wrapped in
    # an outer 1-tuple.
    return ((h0, c0),)


if __name__ == "__main__":
    layers = 2
    embed = 128
    batch = 16

    # Deterministic parameter init (analogue of torch.rand).
    key = jax.random.PRNGKey(0)
    state = jax.random.uniform(
        key, (2, layers, 1, embed), dtype=jnp.float32, minval=0.0, maxval=1.0
    )

    ref = jnp.repeat(state, batch, axis=2)  # (2, layers, batch, embed)

    # Forced Pallas path (small demo shapes would otherwise hit the fallback).
    ((h0, c0),) = lstm_state_gen_forward(state, batch, allow_xla_fallback=False)
    jax.block_until_ready(h0)
    jax.block_until_ready(c0)
    assert h0.shape == (layers, batch, embed)
    assert c0.shape == (layers, batch, embed)
    assert jnp.array_equal(h0, ref[0]) and jnp.array_equal(c0, ref[1])

    # Default path (tiny output -> XLA broadcast fallback), same semantics.
    ((h0f, c0f),) = lstm_state_gen_forward(state, batch)
    jax.block_until_ready(h0f)
    jax.block_until_ready(c0f)
    assert jnp.array_equal(h0f, ref[0]) and jnp.array_equal(c0f, ref[1])

    print("KERNEL_OK")
</pallas_src>

<mosaic_0001>
module attributes {stable_mosaic.version = 11 : i64} {
  func.func @_repeat_kernel(%arg0: i32, %arg1: memref<2x2x1x128xf32, #tpu.memory_space<vmem>>, %arg2: memref<2x16x128xf32, #tpu.memory_space<vmem>>, %arg3: memref<2x16x128xf32, #tpu.memory_space<vmem>>) attributes {dimension_semantics = [#tpu.dimension_semantics<parallel>], iteration_bounds = array<i64: 1>, scalar_prefetch = 0 : i64, scratch_operands = 0 : i64, tpu.core_type = #tpu.core_type<tc>, window_params = [{pipeline_mode = #tpu.pipeline_mode<synchronous>, transform_indices = @transform_0, window_bounds = array<i64: 2, 2, 1, 128>}, {transform_indices = @transform_1, window_bounds = array<i64: 2, 16, 128>}, {transform_indices = @transform_2, window_bounds = array<i64: 2, 16, 128>}]} {
    %c0 = arith.constant 0 : index
    %c0_0 = arith.constant 0 : index
    %c0_1 = arith.constant 0 : index
    %c0_2 = arith.constant 0 : index
    %0 = vector.load %arg1[%c0, %c0_0, %c0_1, %c0_2] : memref<2x2x1x128xf32, #tpu.memory_space<vmem>>, vector<1x2x1x128xf32>
    %1 = vector.shape_cast %0 : vector<1x2x1x128xf32> to vector<2x1x128xf32>
    %2 = vector.shape_cast %1 : vector<2x1x128xf32> to vector<2x1x128xf32>
    %3 = vector.broadcast %2 : vector<2x1x128xf32> to vector<2x16x128xf32>
    %c0_3 = arith.constant 0 : index
    %c0_4 = arith.constant 0 : index
    %c0_5 = arith.constant 0 : index
    %4 = vector.load %arg2[%c0_3, %c0_4, %c0_5] : memref<2x16x128xf32, #tpu.memory_space<vmem>>, vector<2x16x128xf32>
    tpu.vector_store %arg2[%c0_3, %c0_4, %c0_5], %3 {strides = array<i32>} : memref<2x16x128xf32, #tpu.memory_space<vmem>>, vector<2x16x128xf32>,
    %c1 = arith.constant 1 : index
    %c0_6 = arith.constant 0 : index
    %c0_7 = arith.constant 0 : index
    %c0_8 = arith.constant 0 : index
    %5 = vector.load %arg1[%c1, %c0_6, %c0_7, %c0_8] : memref<2x2x1x128xf32, #tpu.memory_space<vmem>>, vector<1x2x1x128xf32>
    %6 = vector.shape_cast %5 : vector<1x2x1x128xf32> to vector<2x1x128xf32>
    %7 = vector.shape_cast %6 : vector<2x1x128xf32> to vector<2x1x128xf32>
    %8 = vector.broadcast %7 : vector<2x1x128xf32> to vector<2x16x128xf32>
    %c0_9 = arith.constant 0 : index
    %c0_10 = arith.constant 0 : index
    %c0_11 = arith.constant 0 : index
    %9 = vector.load %arg3[%c0_9, %c0_10, %c0_11] : memref<2x16x128xf32, #tpu.memory_space<vmem>>, vector<2x16x128xf32>
    tpu.vector_store %arg3[%c0_9, %c0_10, %c0_11], %8 {strides = array<i32>} : memref<2x16x128xf32, #tpu.memory_space<vmem>>, vector<2x16x128xf32>,
    return
  }
  func.func @transform_0(%arg0: i32) -> (i32, i32, i32, i32) {
    %c0_i32 = arith.constant 0 : i32
    %c0_i32_0 = arith.constant 0 : i32
    %c0_i32_1 = arith.constant 0 : i32
    %c0_i32_2 = arith.constant 0 : i32
    %c0_i32_3 = arith.constant 0 : i32
    return %c0_i32, %c0_i32_0, %c0_i32_1, %c0_i32_2 : i32, i32, i32, i32
  }
  func.func @transform_1(%arg0: i32) -> (i32, i32, i32) {
    %c0_i32 = arith.constant 0 : i32
    %c0_i32_0 = arith.constant 0 : i32
    %c0_i32_1 = arith.constant 0 : i32
    return %c0_i32, %arg0, %c0_i32_0 : i32, i32, i32
  }
  func.func @transform_2(%arg0: i32) -> (i32, i32, i32) {
    %c0_i32 = arith.constant 0 : i32
    %c0_i32_0 = arith.constant 0 : i32
    %c0_i32_1 = arith.constant 0 : i32
    return %c0_i32, %arg0, %c0_i32_0 : i32, i32, i32
  }
}

</mosaic_0001>

<bundles_post_ra>
// kernel: tpu_custom_call.1
= control target key start
LH: loop header
LB: loop body
LE: loop exit
PB: predicated region body
PF: predicated region fallthrough
CT: control target
= control target key end

     0   :  { %8 = vsyncpa [#allocation3], 0  ;;  %s251_s0 = inlined_call_operand.hbm [shape: f32[2,2,1,128], index: 0, kind: input, shape index: {}]   ;;  %s252_s1 = inlined_call_operand.hbm [shape: f32[2,16,128], index: 1, kind: output, shape index: {0}]   ;;  %s253_s2 = inlined_call_operand.hbm [shape: f32[2,16,128], index: 2, kind: output, shape index: {1}]  }
   0x1   :  { %9 = vsyncpa [#allocation4], 0 }
   0x2   :  { %10 = vsyncpa [#allocation7], 0  ;;  %s179_s9 = smov [#allocation2]   ;;  %s107_s13 = scalar_lea.hbm %s251_s0, 64 }
   0x3   :  { %s16_s10 = sshll.u32 %s179_s9, 4  ;;  %p108_p0 = scmp.ne.s32.totalorder %s251_s0, %s107_s13  ;;  %s17_s10 = int_to_ptr.vmem [resolvable:$true] %s16_s10 }
   0x4   :  { %p111_p1 = scmp.lt.u32.totalorder %s107_s13, %s251_s0 }
   0x6   :  { %p113_p2 = pnand %p111_p1, %p108_p0 }
   0x8   :  { %116 = shalt.err (!%p113_p2)
}
   0x9   :  { %s117_s18 = scalar_lea.vmem %s17_s10, 64  ;;  %p122_p4 = scmp.lt.s32.totalorder %s17_s10, %s17_s10 }
   0xa   :  { %p118_p3 = scmp.ne.s32.totalorder %s17_s10, %s117_s18  ;;  %p123_p5 = scmp.lt.s32.totalorder %s117_s18, %s117_s18 }
   0xc   :  { %p124_p6 = por %p123_p5, %p122_p4 }
   0xe   :  { %p125_p7 = pnand %p124_p6, %p118_p3 }
  0x10   :  { %128 = shalt.err (!%p125_p7)
}
  0x11   :  { %s180_s19 = smov 16   ;;  %s181_s20 = smov 1  }
  0x12   :  { %22 = dma.hbm_to_vmem [thread:$0]  %s251_s0, 64, %s17_s10, [#allocation3], %s180_s19, %s180_s19, %s181_s20  }
  0x13   :  { %173 = dma.done.wait [#allocation3], 64  }
  0x14   :  { %174 = vsyncadd [#allocation3], 4294967232  ;;  %s182_s23 = smov [#allocation5]   ;;  %s183_s25 = smov [#allocation6]   ;;  %v96_v0 = vld [vmem:[#allocation2] ss:$0 sm:$0xff] }
  0x15   :  { %s68_s24 = sshll.u32 %s182_s23, 4  ;;  %s80_s26 = sshll.u32 %s183_s25, 4  ;;  %v97_v1 = vld [vmem:[#allocation2 + $0x1] ss:$0 sm:$0xff]  ;;  %v98_v2 = vld [vmem:[#allocation2 + $0x2] ss:$0 sm:$0xff]  ;;  %s213_s24 = int_to_ptr.vmem [resolvable:$true] %s68_s24  ;;  %s215_s26 = int_to_ptr.vmem [resolvable:$true] %s80_s26 }
  0x16   :  { %40 = vst [vmem:[#allocation5] sm:$0xff] %v96_v0  ;;  %41 = vst [vmem:[#allocation5 + $0x8] sm:$0xff] %v96_v0  ;;  %v99_v3 = vld [vmem:[#allocation2 + $0x3] ss:$0 sm:$0xff]  ;;  %s129_s0 = scalar_lea.vmem %s213_s24, 512  ;;  %p134_p9 = scmp.lt.s32.totalorder %s213_s24, %s213_s24 }
  0x17   :  { %42 = vst [vmem:[#allocation5 + $0x10] sm:$0xff] %v97_v1  ;;  %43 = vst [vmem:[#allocation5 + $0x18] sm:$0xff] %v97_v1  ;;  %p130_p8 = scmp.ne.s32.totalorder %s213_s24, %s129_s0  ;;  %p135_p10 = scmp.lt.s32.totalorder %s129_s0, %s129_s0 }
  0x18   :  { %59 = vst [vmem:[#allocation6] sm:$0xff] %v98_v2  ;;  %60 = vst [vmem:[#allocation6 + $0x8] sm:$0xff] %v98_v2 }
  0x19   :  { %61 = vst [vmem:[#allocation6 + $0x10] sm:$0xff] %v99_v3  ;;  %62 = vst [vmem:[#allocation6 + $0x18] sm:$0xff] %v99_v3  ;;  %p136_p11 = por %p135_p10, %p134_p9 }
  0x1b   :  { %p137_p12 = pnand %p136_p11, %p130_p8 }
  0x1d   :  { %140 = shalt.err (!%p137_p12)
}
  0x1e   :  { %s141_s29 = scalar_lea.hbm %s252_s1, 512 }
  0x1f   :  { %p142_p13 = scmp.ne.s32.totalorder %s252_s1, %s141_s29  ;;  %p145_p0 = scmp.lt.u32.totalorder %s141_s29, %s252_s1 }
  0x21   :  { %p147_p1 = pnand %p145_p0, %p142_p13 }
  0x23   :  { %150 = shalt.err (!%p147_p1)
}
  0x24   :  { %s184_s6 = smov 128   ;;  %s185_s7 = smov 8  }
  0x25   :  { %74 = dma.vmem_to_hbm [thread:$0]  %s213_s24, 512, %s252_s1, [#allocation4], %s184_s6, %s184_s6, %s185_s7  }
  0x26   :  { %s151_s10 = scalar_lea.vmem %s215_s26, 512  ;;  %p156_p3 = scmp.lt.s32.totalorder %s215_s26, %s215_s26 }
  0x27   :  { %p152_p2 = scmp.ne.s32.totalorder %s215_s26, %s151_s10  ;;  %p157_p4 = scmp.lt.s32.totalorder %s151_s10, %s151_s10 }
  0x29   :  { %p158_p5 = por %p157_p4, %p156_p3 }
  0x2b   :  { %p159_p6 = pnand %p158_p5, %p152_p2 }
  0x2d   :  { %162 = shalt.err (!%p159_p6)
}
  0x2e   :  { %s163_s13 = scalar_lea.hbm %s253_s2, 512 }
  0x2f   :  { %p164_p7 = scmp.ne.s32.totalorder %s253_s2, %s163_s13  ;;  %p167_p8 = scmp.lt.u32.totalorder %s163_s13, %s253_s2 }
  0x31   :  { %p169_p9 = pnand %p167_p8, %p164_p7 }
  0x33   :  { %172 = shalt.err (!%p169_p9)
}
  0x34   :  { %86 = dma.vmem_to_hbm [thread:$0]  %s215_s26, 512, %s253_s2, [#allocation7], %s184_s6, %s184_s6, %s185_s7  }
  0x35   :  { %175 = dma.done.wait [#allocation4], 512  }
  0x36   :  { %176 = vsyncadd [#allocation4], 4294966784 }
  0x37   :  { %177 = dma.done.wait [#allocation7], 512  }
  0x38   :  { %178 = vsyncadd [#allocation7], 4294966784 }
  0x39   :  { %93 = vsyncpa [#allocation3], 1 }
  0x3a   :  { %94 = vsyncpa [#allocation4], 1 }
  0x3b   :  { %95 = vsyncpa [#allocation7], 1 }

</bundles_post_ra>
